<compile_context>
chip_gen: v6e
topology: v6e:2x2x1
jax: 0.10.0
libtpu: 0.0.40
codegen_flags: <defaults>
</compile_context>

<pallas_src>
import functools

import jax
import jax.numpy as jnp
from jax.experimental import pallas as pl
from jax.experimental.pallas import tpu as pltpu

# SoLU defaults used by GatedSoLU.forward (self.act(g) with no extra args).
TEMPERATURE = 1.0
ALPHA = 1.0
LN_EPS = 1e-5  # nn.LayerNorm default


def _round_up(n, m):
    return ((n + m - 1) // m) * m


def _min_tile_rows(dtype):
    """Dtype-aware sublane floor for the batch tile."""
    itemsize = jnp.dtype(dtype).itemsize
    if itemsize >= 4:
        return 8
    if itemsize == 2:
        return 16
    return 32


def _num_tensorcores():
    """Best-effort TensorCore count (v7x has 2/chip); defaults to 1."""
    try:
        info = pltpu.get_tpu_info()
        for attr in ("num_cores", "core_count", "num_tensorcores", "tensorcore_count"):
            v = getattr(info, attr, None)
            if v:
                return int(v)
    except Exception:
        pass
    return 1


def _vmem_limit_bytes(tm, d_in, hidden, d_out_pad, x_itemsize, w_itemsize):
    """Explicit scoped-VMEM budget from the actual footprint (+ headroom)."""
    # Weights single-buffered: [Wg|Wx], [bg|bx], gamma, beta, Wf, bf.
    weight_elems = d_in * 2 * hidden + 2 * hidden + 2 * hidden + hidden * d_out_pad + d_out_pad
    weight_bytes = weight_elems * w_itemsize
    # x tile and out tile are double-buffered by the pipeline.
    io_bytes = 2 * tm * d_in * x_itemsize + 2 * tm * d_out_pad * x_itemsize
    # f32 intermediates inside the body (y, act/h/hn temporaries, out).
    interm_bytes = tm * (2 * hidden + 4 * hidden + d_out_pad) * 4
    need = int((weight_bytes + io_bytes + interm_bytes) * 1.5) + (2 << 20)
    return max(32 << 20, min(need, 64 << 20))


def _activation_norm_project(g, xx, gamma_ref, beta_ref, wf_ref, bf_ref, o_ref):
    """SoLU(g) gate, LayerNorm over hidden, final projection. All f32 math."""
    # SoLU(g) = g * softmax(g / T); T == 1.0 -> scale elided at trace time.
    z = g if TEMPERATURE == 1.0 else g * (1.0 / TEMPERATURE)
    z = z - jnp.max(z, axis=-1, keepdims=True)
    e = jnp.exp(z)
    denom = jnp.sum(e, axis=-1, keepdims=True)
    # Approx reciprocal error is a uniform per-row scale -> cancelled by the
    # LayerNorm below, so it is numerically free here.
    act = g * (e * pl.reciprocal(denom, approx=True))

    # GELU branch only materializes when ALPHA != 1.0 (keeps EUP free and
    # avoids the 0*inf -> NaN edge case).
    if ALPHA != 1.0:
        inv_sqrt2 = jnp.float32(0.7071067811865476)
        gelu = 0.5 * g * (1.0 + jax.lax.erf(g * inv_sqrt2))
        act = (1.0 - ALPHA) * gelu + ALPHA * act

    h = xx * act

    # LayerNorm over hidden dim.
    mu = jnp.mean(h, axis=-1, keepdims=True)
    d = h - mu
    var = jnp.mean(d * d, axis=-1, keepdims=True)
    hn = d * jax.lax.rsqrt(var + LN_EPS)
    hn = hn * gamma_ref[...].astype(jnp.float32) + beta_ref[...].astype(jnp.float32)

    # out = fc_f(hn)
    out = jnp.dot(hn.astype(wf_ref.dtype), wf_ref[...],
                  preferred_element_type=jnp.float32)
    out = out + bf_ref[...].astype(jnp.float32)
    o_ref[...] = out.astype(o_ref.dtype)


def gated_solu_kernel_merged(x_ref, w_in_ref, b_in_ref, gamma_ref, beta_ref,
                             wf_ref, bf_ref, o_ref, *, hidden):
    # Single MXU matmul for both input projections: y = x @ [Wg | Wx] + [bg | bx].
    y = jnp.dot(x_ref[...], w_in_ref[...], preferred_element_type=jnp.float32)
    y = y + b_in_ref[...].astype(jnp.float32)
    g = y[:, :hidden]      # fc_g(x)   (hidden is a multiple of 128 -> lane-aligned slice)
    xx = y[:, hidden:]     # fc_x(x)
    _activation_norm_project(g, xx, gamma_ref, beta_ref, wf_ref, bf_ref, o_ref)


def gated_solu_kernel_split(x_ref, wg_ref, bg_ref, wx_ref, bx_ref, gamma_ref,
                            beta_ref, wf_ref, bf_ref, o_ref):
    # Fallback when H % 128 != 0: two separate matmuls, no mid-tile lane split.
    x = x_ref[...]
    g = jnp.dot(x, wg_ref[...], preferred_element_type=jnp.float32)
    g = g + bg_ref[...].astype(jnp.float32)
    xx = jnp.dot(x, wx_ref[...], preferred_element_type=jnp.float32)
    xx = xx + bx_ref[...].astype(jnp.float32)
    _activation_norm_project(g, xx, gamma_ref, beta_ref, wf_ref, bf_ref, o_ref)


def prepare_gated_solu_params(wg, bg, wx, bx, gamma, beta, wf, bf, *,
                              compute_dtype=None):
    """One-time weight prep (merge/pad/cast). Call at model init, not per step."""
    d_in, hidden = wg.shape
    d_out = wf.shape[1]
    d_out_pad = _round_up(d_out, 128)
    w_dtype = compute_dtype if compute_dtype is not None else wf.dtype

    if d_out_pad != d_out:
        wf = jnp.pad(wf, ((0, 0), (0, d_out_pad - d_out)))
        bf = jnp.pad(bf, ((0, 0), (0, d_out_pad - d_out)))

    merged = (hidden % 128 == 0)
    if merged:
        weights = (jnp.concatenate([wg, wx], axis=1).astype(w_dtype),   # (D_in, 2H)
                   jnp.concatenate([bg, bx], axis=1))                   # (1, 2H)
    else:
        weights = (wg.astype(w_dtype), bg, wx.astype(w_dtype), bx)

    return dict(merged=merged, d_in=d_in, hidden=hidden, d_out=d_out,
                d_out_pad=d_out_pad, weights=weights,
                gamma=gamma, beta=beta,
                wf=wf.astype(w_dtype), bf=bf,
                compute_dtype=compute_dtype)


def gated_solu(x, params, *, tm=256, vmem_limit_bytes=None):
    """Fused GatedSoLU forward using params from prepare_gated_solu_params()."""
    B, d_in = x.shape
    assert d_in == params["d_in"]
    hidden = params["hidden"]
    d_out = params["d_out"]
    d_out_pad = params["d_out_pad"]
    out_dtype = x.dtype

    if params["compute_dtype"] is not None:
        x = x.astype(params["compute_dtype"])

    # Batch tiling: big tiles, dtype-aware row floor, no over-padding of tiny
    # batches; split into >= num_cores grid steps only when the chip actually
    # has more than one TensorCore (v7x).
    min_rows = _min_tile_rows(x.dtype)
    tm_eff = max(min_rows, min(tm, _round_up(B, min_rows)))
    B_pad = _round_up(B, tm_eff)
    cores = _num_tensorcores()
    if cores >= 2 and (B_pad // tm_eff) < cores and B_pad >= cores * min_rows:
        tm_eff = max(min_rows, _round_up(pl.cdiv(B_pad, cores), min_rows))
        B_pad = _round_up(B, tm_eff)
    if B_pad != B:
        x = jnp.pad(x, ((0, B_pad - B), (0, 0)))
    grid = (B_pad // tm_eff,)

    w_itemsize = jnp.dtype(params["wf"].dtype).itemsize
    x_itemsize = jnp.dtype(x.dtype).itemsize
    if vmem_limit_bytes is None:
        vmem_limit_bytes = _vmem_limit_bytes(tm_eff, d_in, hidden, d_out_pad,
                                             x_itemsize, w_itemsize)

    flops = 2 * B_pad * d_in * 2 * hidden + 2 * B_pad * hidden * d_out_pad
    transcendentals = B_pad * hidden + 2 * B_pad
    bytes_accessed = (B_pad * d_in * x_itemsize
                      + (d_in * 2 * hidden + hidden * d_out_pad + 4 * hidden + d_out_pad) * w_itemsize
                      + B_pad * d_out_pad * x_itemsize)
    cost = pl.CostEstimate(flops=flops, transcendentals=transcendentals,
                           bytes_accessed=bytes_accessed)

    full = lambda i: (0, 0)

    if params["merged"]:
        w_in, b_in = params["weights"]
        kernel = functools.partial(gated_solu_kernel_merged, hidden=hidden)
        weight_args = (w_in, b_in)
        weight_shapes = [(d_in, 2 * hidden), (1, 2 * hidden)]
    else:
        wg, bg, wx, bx = params["weights"]
        kernel = gated_solu_kernel_split
        weight_args = (wg, bg, wx, bx)
        weight_shapes = [(d_in, hidden), (1, hidden), (d_in, hidden), (1, hidden)]
    weight_shapes += [(1, hidden), (1, hidden), (hidden, d_out_pad), (1, d_out_pad)]
    args = (x,) + weight_args + (params["gamma"], params["beta"],
                                 params["wf"], params["bf"])

    def build_and_call(single_buffer_weights):
        if single_buffer_weights:
            # Constant index_map -> double-buffering these only burns VMEM.
            const_spec = lambda shape: pl.BlockSpec(shape, full,
                                                    pipeline_mode=pl.Buffered(1))
        else:
            const_spec = lambda shape: pl.BlockSpec(shape, full)
        in_specs = ([pl.BlockSpec((tm_eff, d_in), lambda i: (i, 0))]
                    + [const_spec(s) for s in weight_shapes])
        return pl.pallas_call(
            kernel,
            out_shape=jax.ShapeDtypeStruct((B_pad, d_out_pad), out_dtype),
            grid_spec=pltpu.PrefetchScalarGridSpec(
                num_scalar_prefetch=0,
                grid=grid,
                in_specs=in_specs,
                out_specs=pl.BlockSpec((tm_eff, d_out_pad), lambda i: (i, 0)),
            ),
            compiler_params=pltpu.CompilerParams(
                dimension_semantics=("parallel",),
                vmem_limit_bytes=vmem_limit_bytes),
            cost_estimate=cost,
        )(*args)

    try:
        out = build_and_call(single_buffer_weights=True)
    except Exception:
        # Older/stricter jax may reject pipeline_mode on these specs; the
        # double-buffered fallback is functionally identical.
        out = build_and_call(single_buffer_weights=False)

    return out[:B, :d_out]


def gated_solu_reference(x, wg, bg, wx, bx, gamma, beta, wf, bf):
    hp = jax.lax.Precision.HIGHEST
    g = jnp.dot(x, wg, precision=hp) + bg
    xx = jnp.dot(x, wx, precision=hp) + bx
    sm = jax.nn.softmax(g * (1.0 / TEMPERATURE), axis=-1)
    solu = g * sm
    gelu = 0.5 * g * (1.0 + jax.lax.erf(g / jnp.sqrt(2.0)))
    act = (1.0 - ALPHA) * gelu + ALPHA * solu
    h = xx * act
    mu = jnp.mean(h, axis=-1, keepdims=True)
    var = jnp.mean((h - mu) ** 2, axis=-1, keepdims=True)
    hn = (h - mu) * jax.lax.rsqrt(var + LN_EPS)
    hn = hn * gamma + beta
    return jnp.dot(hn, wf, precision=hp) + bf


def _make_weights(key, d_in, hid, d_out):
    kwg, kbg, kwx, kbx, kwf, kbf = jax.random.split(key, 6)
    wg = jax.random.normal(kwg, (d_in, hid), dtype=jnp.float32) * 0.1
    bg = jax.random.normal(kbg, (1, hid), dtype=jnp.float32) * 0.1
    wx = jax.random.normal(kwx, (d_in, hid), dtype=jnp.float32) * 0.1
    bx = jax.random.normal(kbx, (1, hid), dtype=jnp.float32) * 0.1
    wf = jax.random.normal(kwf, (hid, d_out), dtype=jnp.float32) * 0.1
    bf = jax.random.normal(kbf, (1, d_out), dtype=jnp.float32) * 0.1
    gamma = jnp.ones((1, hid), dtype=jnp.float32)    # nn.LayerNorm default init
    beta = jnp.zeros((1, hid), dtype=jnp.float32)
    return wg, bg, wx, bx, gamma, beta, wf, bf


if __name__ == "__main__":
    B, D_IN, D_OUT = 16, 32, 32
    key = jax.random.PRNGKey(0)
    kx, kw1, kw2 = jax.random.split(key, 3)
    x = jax.random.normal(kx, (B, D_IN), dtype=jnp.float32)

    # --- Config 1: H = 128 -> merged [Wg|Wx] path, f32 ---
    w1 = _make_weights(kw1, D_IN, 128, D_OUT)
    p1 = prepare_gated_solu_params(*w1)                 # one-time weight prep
    out1 = jax.block_until_ready(gated_solu(x, p1))
    ref1 = gated_solu_reference(x, *w1)
    assert out1.shape == (B, D_OUT)
    # Tolerance covers MXU default-precision f32 matmul vs HIGHEST-precision ref.
    assert jnp.allclose(out1, ref1, atol=2e-2, rtol=2e-2), "merged path mismatch"

    # --- Config 2: H = 160 (not a lane multiple) -> split two-matmul path ---
    w2 = _make_weights(kw2, D_IN, 160, D_OUT)
    p2 = prepare_gated_solu_params(*w2)
    out2 = jax.block_until_ready(gated_solu(x, p2))
    ref2 = gated_solu_reference(x, *w2)
    assert out2.shape == (B, D_OUT)
    assert jnp.allclose(out2, ref2, atol=2e-2, rtol=2e-2), "split path mismatch"

    # --- Config 3: bf16 compute path (MXU-native weights, f32 accumulate) ---
    p3 = prepare_gated_solu_params(*w1, compute_dtype=jnp.bfloat16)
    out3 = jax.block_until_ready(gated_solu(x, p3))
    assert out3.shape == (B, D_OUT)
    assert bool(jnp.all(jnp.isfinite(out3))), "bf16 path produced non-finite values"

    print("KERNEL_OK")
</pallas_src>

<mosaic_0001>
module attributes {stable_mosaic.version = 11 : i64} {
  func.func @gated_solu_kernel_merged(%arg0: i32, %arg1: memref<16x32xf32, #tpu.memory_space<vmem>>, %arg2: memref<32x256xf32, #tpu.memory_space<vmem>>, %arg3: memref<1x256xf32, #tpu.memory_space<vmem>>, %arg4: memref<1x128xf32, #tpu.memory_space<vmem>>, %arg5: memref<1x128xf32, #tpu.memory_space<vmem>>, %arg6: memref<128x128xf32, #tpu.memory_space<vmem>>, %arg7: memref<1x128xf32, #tpu.memory_space<vmem>>, %arg8: memref<16x128xf32, #tpu.memory_space<vmem>>) attributes {dimension_semantics = [#tpu.dimension_semantics<parallel>], iteration_bounds = array<i64: 1>, scalar_prefetch = 0 : i64, scratch_operands = 0 : i64, tpu.core_type = #tpu.core_type<tc>, window_params = [{transform_indices = @transform_0, window_bounds = array<i64: 16, 32>}, {pipeline_mode = #tpu.pipeline_mode<synchronous>, transform_indices = @transform_1, window_bounds = array<i64: 32, 256>}, {pipeline_mode = #tpu.pipeline_mode<synchronous>, transform_indices = @transform_2, window_bounds = array<i64: 1, 256>}, {pipeline_mode = #tpu.pipeline_mode<synchronous>, transform_indices = @transform_3, window_bounds = array<i64: 1, 128>}, {pipeline_mode = #tpu.pipeline_mode<synchronous>, transform_indices = @transform_4, window_bounds = array<i64: 1, 128>}, {pipeline_mode = #tpu.pipeline_mode<synchronous>, transform_indices = @transform_5, window_bounds = array<i64: 128, 128>}, {pipeline_mode = #tpu.pipeline_mode<synchronous>, transform_indices = @transform_6, window_bounds = array<i64: 1, 128>}, {transform_indices = @transform_7, window_bounds = array<i64: 16, 128>}]} {
    %c0 = arith.constant 0 : index
    %c0_0 = arith.constant 0 : index
    %0 = vector.load %arg1[%c0, %c0_0] : memref<16x32xf32, #tpu.memory_space<vmem>>, vector<16x32xf32>
    %c0_1 = arith.constant 0 : index
    %c0_2 = arith.constant 0 : index
    %1 = vector.load %arg2[%c0_1, %c0_2] : memref<32x256xf32, #tpu.memory_space<vmem>>, vector<32x256xf32>
    %cst = arith.constant dense<0.000000e+00> : vector<16x256xf32>
    %2 = tpu.matmul %0, %1, %cst {dimension_numbers = #tpu.dot_dimension_numbers<[1], [0], [0], [1], [0, 0, 1, 1], [], []>} : vector<16x32xf32>, vector<32x256xf32>, vector<16x256xf32> -> vector<16x256xf32>
    %c0_3 = arith.constant 0 : index
    %c0_4 = arith.constant 0 : index
    %3 = vector.load %arg3[%c0_3, %c0_4] : memref<1x256xf32, #tpu.memory_space<vmem>>, vector<1x256xf32>
    %4 = vector.broadcast %3 : vector<1x256xf32> to vector<16x256xf32>
    %5 = arith.addf %2, %4 : vector<16x256xf32>
    %6 = vector.extract_strided_slice %5 {offsets = [0, 0], sizes = [16, 128], strides = [1, 1]} : vector<16x256xf32> to vector<16x128xf32>
    %7 = vector.extract_strided_slice %5 {offsets = [0, 128], sizes = [16, 128], strides = [1, 1]} : vector<16x256xf32> to vector<16x128xf32>
    %cst_5 = arith.constant dense<0xFF800000> : vector<16xf32>
    %8 = vector.multi_reduction <maximumf>, %6, %cst_5 [1] : vector<16x128xf32> to vector<16xf32>
    %9 = vector.shape_cast %8 : vector<16xf32> to vector<16x1xf32>
    %10 = vector.broadcast %9 : vector<16x1xf32> to vector<16x128xf32>
    %11 = arith.subf %6, %10 : vector<16x128xf32>
    %12 = math.exp %11 : vector<16x128xf32>
    %cst_6 = arith.constant dense<0.000000e+00> : vector<16xf32>
    %13 = vector.multi_reduction <add>, %12, %cst_6 [1] : vector<16x128xf32> to vector<16xf32>
    %14 = vector.shape_cast %13 : vector<16xf32> to vector<16x1xf32>
    %15 = tpu.reciprocal %14 {approx = true} : vector<16x1xf32> -> vector<16x1xf32>
    %16 = vector.broadcast %15 : vector<16x1xf32> to vector<16x128xf32>
    %17 = arith.mulf %12, %16 : vector<16x128xf32>
    %18 = arith.mulf %6, %17 : vector<16x128xf32>
    %19 = arith.mulf %7, %18 : vector<16x128xf32>
    %cst_7 = arith.constant dense<0.000000e+00> : vector<16xf32>
    %20 = vector.multi_reduction <add>, %19, %cst_7 [1] : vector<16x128xf32> to vector<16xf32>
    %21 = vector.shape_cast %20 : vector<16xf32> to vector<16x1xf32>
    %cst_8 = arith.constant 1.280000e+02 : f32
    %22 = vector.broadcast %cst_8 : f32 to vector<16x1xf32>
    %23 = arith.divf %21, %22 : vector<16x1xf32>
    %24 = vector.broadcast %23 : vector<16x1xf32> to vector<16x128xf32>
    %25 = arith.subf %19, %24 : vector<16x128xf32>
    %26 = arith.mulf %25, %25 : vector<16x128xf32>
    %cst_9 = arith.constant dense<0.000000e+00> : vector<16xf32>
    %27 = vector.multi_reduction <add>, %26, %cst_9 [1] : vector<16x128xf32> to vector<16xf32>
    %28 = vector.shape_cast %27 : vector<16xf32> to vector<16x1xf32>
    %cst_10 = arith.constant 1.280000e+02 : f32
    %29 = vector.broadcast %cst_10 : f32 to vector<16x1xf32>
    %30 = arith.divf %28, %29 : vector<16x1xf32>
    %cst_11 = arith.constant 9.99999974E-6 : f32
    %31 = vector.broadcast %cst_11 : f32 to vector<16x1xf32>
    %32 = arith.addf %30, %31 : vector<16x1xf32>
    %33 = math.rsqrt %32 : vector<16x1xf32>
    %34 = vector.broadcast %33 : vector<16x1xf32> to vector<16x128xf32>
    %35 = arith.mulf %25, %34 : vector<16x128xf32>
    %c0_12 = arith.constant 0 : index
    %c0_13 = arith.constant 0 : index
    %36 = vector.load %arg4[%c0_12, %c0_13] : memref<1x128xf32, #tpu.memory_space<vmem>>, vector<1x128xf32>
    %37 = vector.broadcast %36 : vector<1x128xf32> to vector<16x128xf32>
    %38 = arith.mulf %35, %37 : vector<16x128xf32>
    %c0_14 = arith.constant 0 : index
    %c0_15 = arith.constant 0 : index
    %39 = vector.load %arg5[%c0_14, %c0_15] : memref<1x128xf32, #tpu.memory_space<vmem>>, vector<1x128xf32>
    %40 = vector.broadcast %39 : vector<1x128xf32> to vector<16x128xf32>
    %41 = arith.addf %38, %40 : vector<16x128xf32>
    %c0_16 = arith.constant 0 : index
    %c0_17 = arith.constant 0 : index
    %42 = vector.load %arg6[%c0_16, %c0_17] : memref<128x128xf32, #tpu.memory_space<vmem>>, vector<128x128xf32>
    %cst_18 = arith.constant dense<0.000000e+00> : vector<16x128xf32>
    %43 = tpu.matmul %41, %42, %cst_18 {dimension_numbers = #tpu.dot_dimension_numbers<[1], [0], [0], [1], [0, 0, 1, 1], [], []>} : vector<16x128xf32>, vector<128x128xf32>, vector<16x128xf32> -> vector<16x128xf32>
    %c0_19 = arith.constant 0 : index
    %c0_20 = arith.constant 0 : index
    %44 = vector.load %arg7[%c0_19, %c0_20] : memref<1x128xf32, #tpu.memory_space<vmem>>, vector<1x128xf32>
    %45 = vector.broadcast %44 : vector<1x128xf32> to vector<16x128xf32>
    %46 = arith.addf %43, %45 : vector<16x128xf32>
    %c0_21 = arith.constant 0 : index
    %c0_22 = arith.constant 0 : index
    %47 = vector.load %arg8[%c0_21, %c0_22] : memref<16x128xf32, #tpu.memory_space<vmem>>, vector<16x128xf32>
    tpu.vector_store %arg8[%c0_21, %c0_22], %46 {strides = array<i32>} : memref<16x128xf32, #tpu.memory_space<vmem>>, vector<16x128xf32>,
    return
  }
  func.func @transform_0(%arg0: i32) -> (i32, i32) {
    %c0_i32 = arith.constant 0 : i32
    %c0_i32_0 = arith.constant 0 : i32
    return %arg0, %c0_i32 : i32, i32
  }
  func.func @transform_1(%arg0: i32) -> (i32, i32) {
    %c0_i32 = arith.constant 0 : i32
    %c0_i32_0 = arith.constant 0 : i32
    %c0_i32_1 = arith.constant 0 : i32
    return %c0_i32, %c0_i32_0 : i32, i32
  }
  func.func @transform_2(%arg0: i32) -> (i32, i32) {
    %c0_i32 = arith.constant 0 : i32
    %c0_i32_0 = arith.constant 0 : i32
    %c0_i32_1 = arith.constant 0 : i32
    return %c0_i32, %c0_i32_0 : i32, i32
  }
  func.func @transform_3(%arg0: i32) -> (i32, i32) {
    %c0_i32 = arith.constant 0 : i32
    %c0_i32_0 = arith.constant 0 : i32
    %c0_i32_1 = arith.constant 0 : i32
    return %c0_i32, %c0_i32_0 : i32, i32
  }
  func.func @transform_4(%arg0: i32) -> (i32, i32) {
    %c0_i32 = arith.constant 0 : i32
    %c0_i32_0 = arith.constant 0 : i32
    %c0_i32_1 = arith.constant 0 : i32
    return %c0_i32, %c0_i32_0 : i32, i32
  }
  func.func @transform_5(%arg0: i32) -> (i32, i32) {
    %c0_i32 = arith.constant 0 : i32
    %c0_i32_0 = arith.constant 0 : i32
    %c0_i32_1 = arith.constant 0 : i32
    return %c0_i32, %c0_i32_0 : i32, i32
  }
  func.func @transform_6(%arg0: i32) -> (i32, i32) {
    %c0_i32 = arith.constant 0 : i32
    %c0_i32_0 = arith.constant 0 : i32
    %c0_i32_1 = arith.constant 0 : i32
    return %c0_i32, %c0_i32_0 : i32, i32
  }
  func.func @transform_7(%arg0: i32) -> (i32, i32) {
    %c0_i32 = arith.constant 0 : i32
    %c0_i32_0 = arith.constant 0 : i32
    return %arg0, %c0_i32 : i32, i32
  }
}

module attributes {stable_mosaic.version = 11 : i64} {
  func.func @gated_solu_kernel_merged(%arg0: i32, %arg1: memref<16x32xf32, #tpu.memory_space<vmem>>, %arg2: memref<32x256xf32, #tpu.memory_space<vmem>>, %arg3: memref<1x256xf32, #tpu.memory_space<vmem>>, %arg4: memref<1x128xf32, #tpu.memory_space<vmem>>, %arg5: memref<1x128xf32, #tpu.memory_space<vmem>>, %arg6: memref<128x128xf32, #tpu.memory_space<vmem>>, %arg7: memref<1x128xf32, #tpu.memory_space<vmem>>, %arg8: memref<16x128xf32, #tpu.memory_space<vmem>>) attributes {dimension_semantics = [#tpu.dimension_semantics<parallel>], iteration_bounds = array<i64: 1>, scalar_prefetch = 0 : i64, scratch_operands = 0 : i64, tpu.core_type = #tpu.core_type<tc>, window_params = [{transform_indices = @transform_0, window_bounds = array<i64: 16, 32>}, {pipeline_mode = #tpu.pipeline_mode<synchronous>, transform_indices = @transform_1, window_bounds = array<i64: 32, 256>}, {pipeline_mode = #tpu.pipeline_mode<synchronous>, transform_indices = @transform_2, window_bounds = array<i64: 1, 256>}, {pipeline_mode = #tpu.pipeline_mode<synchronous>, transform_indices = @transform_3, window_bounds = array<i64: 1, 128>}, {pipeline_mode = #tpu.pipeline_mode<synchronous>, transform_indices = @transform_4, window_bounds = array<i64: 1, 128>}, {pipeline_mode = #tpu.pipeline_mode<synchronous>, transform_indices = @transform_5, window_bounds = array<i64: 128, 128>}, {pipeline_mode = #tpu.pipeline_mode<synchronous>, transform_indices = @transform_6, window_bounds = array<i64: 1, 128>}, {transform_indices = @transform_7, window_bounds = array<i64: 16, 128>}]} {
    %c0 = arith.constant 0 : index
    %c0_0 = arith.constant 0 : index
    %0 = vector.load %arg1[%c0, %c0_0] : memref<16x32xf32, #tpu.memory_space<vmem>>, vector<16x32xf32>
    %c0_1 = arith.constant 0 : index
    %c0_2 = arith.constant 0 : index
    %1 = vector.load %arg2[%c0_1, %c0_2] : memref<32x256xf32, #tpu.memory_space<vmem>>, vector<32x256xf32>
    %cst = arith.constant dense<0.000000e+00> : vector<16x256xf32>
    %2 = tpu.matmul %0, %1, %cst {dimension_numbers = #tpu.dot_dimension_numbers<[1], [0], [0], [1], [0, 0, 1, 1], [], []>} : vector<16x32xf32>, vector<32x256xf32>, vector<16x256xf32> -> vector<16x256xf32>
    %c0_3 = arith.constant 0 : index
    %c0_4 = arith.constant 0 : index
    %3 = vector.load %arg3[%c0_3, %c0_4] : memref<1x256xf32, #tpu.memory_space<vmem>>, vector<1x256xf32>
    %4 = vector.broadcast %3 : vector<1x256xf32> to vector<16x256xf32>
    %5 = arith.addf %2, %4 : vector<16x256xf32>
    %6 = vector.extract_strided_slice %5 {offsets = [0, 0], sizes = [16, 128], strides = [1, 1]} : vector<16x256xf32> to vector<16x128xf32>
    %7 = vector.extract_strided_slice %5 {offsets = [0, 128], sizes = [16, 128], strides = [1, 1]} : vector<16x256xf32> to vector<16x128xf32>
    %cst_5 = arith.constant dense<0xFF800000> : vector<16xf32>
    %8 = vector.multi_reduction <maximumf>, %6, %cst_5 [1] : vector<16x128xf32> to vector<16xf32>
    %9 = vector.shape_cast %8 : vector<16xf32> to vector<16x1xf32>
    %10 = vector.broadcast %9 : vector<16x1xf32> to vector<16x128xf32>
    %11 = arith.subf %6, %10 : vector<16x128xf32>
    %12 = math.exp %11 : vector<16x128xf32>
    %cst_6 = arith.constant dense<0.000000e+00> : vector<16xf32>
    %13 = vector.multi_reduction <add>, %12, %cst_6 [1] : vector<16x128xf32> to vector<16xf32>
    %14 = vector.shape_cast %13 : vector<16xf32> to vector<16x1xf32>
    %15 = tpu.reciprocal %14 {approx = true} : vector<16x1xf32> -> vector<16x1xf32>
    %16 = vector.broadcast %15 : vector<16x1xf32> to vector<16x128xf32>
    %17 = arith.mulf %12, %16 : vector<16x128xf32>
    %18 = arith.mulf %6, %17 : vector<16x128xf32>
    %19 = arith.mulf %7, %18 : vector<16x128xf32>
    %cst_7 = arith.constant dense<0.000000e+00> : vector<16xf32>
    %20 = vector.multi_reduction <add>, %19, %cst_7 [1] : vector<16x128xf32> to vector<16xf32>
    %21 = vector.shape_cast %20 : vector<16xf32> to vector<16x1xf32>
    %cst_8 = arith.constant 1.280000e+02 : f32
    %22 = vector.broadcast %cst_8 : f32 to vector<16x1xf32>
    %23 = arith.divf %21, %22 : vector<16x1xf32>
    %24 = vector.broadcast %23 : vector<16x1xf32> to vector<16x128xf32>
    %25 = arith.subf %19, %24 : vector<16x128xf32>
    %26 = arith.mulf %25, %25 : vector<16x128xf32>
    %cst_9 = arith.constant dense<0.000000e+00> : vector<16xf32>
    %27 = vector.multi_reduction <add>, %26, %cst_9 [1] : vector<16x128xf32> to vector<16xf32>
    %28 = vector.shape_cast %27 : vector<16xf32> to vector<16x1xf32>
    %cst_10 = arith.constant 1.280000e+02 : f32
    %29 = vector.broadcast %cst_10 : f32 to vector<16x1xf32>
    %30 = arith.divf %28, %29 : vector<16x1xf32>
    %cst_11 = arith.constant 9.99999974E-6 : f32
    %31 = vector.broadcast %cst_11 : f32 to vector<16x1xf32>
    %32 = arith.addf %30, %31 : vector<16x1xf32>
    %33 = math.rsqrt %32 : vector<16x1xf32>
    %34 = vector.broadcast %33 : vector<16x1xf32> to vector<16x128xf32>
    %35 = arith.mulf %25, %34 : vector<16x128xf32>
    %c0_12 = arith.constant 0 : index
    %c0_13 = arith.constant 0 : index
    %36 = vector.load %arg4[%c0_12, %c0_13] : memref<1x128xf32, #tpu.memory_space<vmem>>, vector<1x128xf32>
    %37 = vector.broadcast %36 : vector<1x128xf32> to vector<16x128xf32>
    %38 = arith.mulf %35, %37 : vector<16x128xf32>
    %c0_14 = arith.constant 0 : index
    %c0_15 = arith.constant 0 : index
    %39 = vector.load %arg5[%c0_14, %c0_15] : memref<1x128xf32, #tpu.memory_space<vmem>>, vector<1x128xf32>
    %40 = vector.broadcast %39 : vector<1x128xf32> to vector<16x128xf32>
    %41 = arith.addf %38, %40 : vector<16x128xf32>
    %c0_16 = arith.constant 0 : index
    %c0_17 = arith.constant 0 : index
    %42 = vector.load %arg6[%c0_16, %c0_17] : memref<128x128xf32, #tpu.memory_space<vmem>>, vector<128x128xf32>
    %cst_18 = arith.constant dense<0.000000e+00> : vector<16x128xf32>
    %43 = tpu.matmul %41, %42, %cst_18 {dimension_numbers = #tpu.dot_dimension_numbers<[1], [0], [0], [1], [0, 0, 1, 1], [], []>} : vector<16x128xf32>, vector<128x128xf32>, vector<16x128xf32> -> vector<16x128xf32>
    %c0_19 = arith.constant 0 : index
    %c0_20 = arith.constant 0 : index
    %44 = vector.load %arg7[%c0_19, %c0_20] : memref<1x128xf32, #tpu.memory_space<vmem>>, vector<1x128xf32>
    %45 = vector.broadcast %44 : vector<1x128xf32> to vector<16x128xf32>
    %46 = arith.addf %43, %45 : vector<16x128xf32>
    %c0_21 = arith.constant 0 : index
    %c0_22 = arith.constant 0 : index
    %47 = vector.load %arg8[%c0_21, %c0_22] : memref<16x128xf32, #tpu.memory_space<vmem>>, vector<16x128xf32>
    tpu.vector_store %arg8[%c0_21, %c0_22], %46 {strides = array<i32>} : memref<16x128xf32, #tpu.memory_space<vmem>>, vector<16x128xf32>,
    return
  }
  func.func @transform_0(%arg0: i32) -> (i32, i32) {
    %c0_i32 = arith.constant 0 : i32
    %c0_i32_0 = arith.constant 0 : i32
    return %arg0, %c0_i32 : i32, i32
  }
  func.func @transform_1(%arg0: i32) -> (i32, i32) {
    %c0_i32 = arith.constant 0 : i32
    %c0_i32_0 = arith.constant 0 : i32
    %c0_i32_1 = arith.constant 0 : i32
    return %c0_i32, %c0_i32_0 : i32, i32
  }
  func.func @transform_2(%arg0: i32) -> (i32, i32) {
    %c0_i32 = arith.constant 0 : i32
    %c0_i32_0 = arith.constant 0 : i32
    %c0_i32_1 = arith.constant 0 : i32
    return %c0_i32, %c0_i32_0 : i32, i32
  }
  func.func @transform_3(%arg0: i32) -> (i32, i32) {
    %c0_i32 = arith.constant 0 : i32
    %c0_i32_0 = arith.constant 0 : i32
    %c0_i32_1 = arith.constant 0 : i32
    return %c0_i32, %c0_i32_0 : i32, i32
  }
  func.func @transform_4(%arg0: i32) -> (i32, i32) {
    %c0_i32 = arith.constant 0 : i32
    %c0_i32_0 = arith.constant 0 : i32
    %c0_i32_1 = arith.constant 0 : i32
    return %c0_i32, %c0_i32_0 : i32, i32
  }
  func.func @transform_5(%arg0: i32) -> (i32, i32) {
    %c0_i32 = arith.constant 0 : i32
    %c0_i32_0 = arith.constant 0 : i32
    %c0_i32_1 = arith.constant 0 : i32
    return %c0_i32, %c0_i32_0 : i32, i32
  }
  func.func @transform_6(%arg0: i32) -> (i32, i32) {
    %c0_i32 = arith.constant 0 : i32
    %c0_i32_0 = arith.constant 0 : i32
    %c0_i32_1 = arith.constant 0 : i32
    return %c0_i32, %c0_i32_0 : i32, i32
  }
  func.func @transform_7(%arg0: i32) -> (i32, i32) {
    %c0_i32 = arith.constant 0 : i32
    %c0_i32_0 = arith.constant 0 : i32
    return %arg0, %c0_i32 : i32, i32
  }
}

</mosaic_0001>

<bundles_post_ra>
// kernel: tpu_custom_call.1
= control target key start
LH: loop header
LB: loop body
LE: loop exit
PB: predicated region body
PF: predicated region fallthrough
CT: control target
= control target key end

     0   :  { %12 = vsyncpa [#allocation3], 0  ;;  %s602_s0 = inlined_call_operand.hbm [shape: f32[16,32], index: 0, kind: input, shape index: {}]   ;;  %s603_s1 = inlined_call_operand.hbm [shape: f32[32,256], index: 1, kind: input, shape index: {}]   ;;  %s604_s2 = inlined_call_operand.vmem [shape: f32[1,256], index: 2, kind: input, shape index: {}]   ;;  %s605_s3 = inlined_call_operand.vmem [shape: f32[1,128], index: 3, kind: input, shape index: {}]   ;;  %s606_s4 = inlined_call_operand.vmem [shape: f32[1,128], index: 4, kind: input, shape index: {}]   ;;  %s607_s5 = inlined_call_operand.hbm [shape: f32[128,128], index: 5, kind: input, shape index: {}]   ;;  %s608_s6 = inlined_call_operand.vmem [shape: f32[1,128], index: 6, kind: input, shape index: {}]   ;;  %s609_s7 = inlined_call_operand.hbm [shape: f32[16,128], index: 7, kind: output, shape index: {}]  }
   0x1   :  { %13 = vsyncpa [#allocation6], 0 }
   0x2   :  { %14 = vsyncpa [#allocation4], 0  ;;  %s520_s24 = smov [#allocation5]  }
   0x3   :  { %s32_s25 = sshll.u32 %s520_s24, 4  ;;  %s33_s25 = int_to_ptr.vmem [resolvable:$true] %s32_s25 }
   0x4   :  { %s442_s26 = scalar_lea.vmem %s33_s25, 1024  ;;  %p447_p1 = scmp.lt.s32.totalorder %s33_s25, %s33_s25 }
   0x5   :  { %p443_p0 = scmp.ne.s32.totalorder %s33_s25, %s442_s26  ;;  %p448_p2 = scmp.lt.s32.totalorder %s442_s26, %s442_s26 }
   0x7   :  { %p449_p3 = por %p448_p2, %p447_p1 }
   0x9   :  { %p450_p4 = pnand %p449_p3, %p443_p0 }
   0xb   :  { %453 = shalt.err (!%p450_p4)
}
   0xc   :  { %s521_s27 = smov 256   ;;  %s522_s28 = smov 16  }
   0xd   :  { %38 = dma.hbm_to_vmem [thread:$0]  %s603_s1, 1024, %s33_s25, [#allocation6], %s521_s27, %s521_s27, %s522_s28  }
   0xe   :  { %s523_s8 = smov [#allocation2]  }
   0xf   :  { %s20_s9 = sshll.u32 %s523_s8, 4  ;;  %s21_s9 = int_to_ptr.vmem [resolvable:$true] %s20_s9 }
  0x10   :  { %s462_s10 = scalar_lea.vmem %s21_s9, 256  ;;  %p467_p6 = scmp.lt.s32.totalorder %s21_s9, %s21_s9 }
  0x11   :  { %p463_p5 = scmp.ne.s32.totalorder %s21_s9, %s462_s10  ;;  %p468_p7 = scmp.lt.s32.totalorder %s462_s10, %s462_s10 }
  0x13   :  { %p469_p8 = por %p468_p7, %p467_p6 }
  0x15   :  { %p470_p9 = pnand %p469_p8, %p463_p5 }
  0x17   :  { %473 = shalt.err (!%p470_p9)
}
  0x18   :  { %s524_s11 = smov 128   ;;  %s525_s12 = smov 8  }
  0x19   :  { %26 = dma.hbm_to_vmem [thread:$0]  %s602_s0, 256, %s21_s9, [#allocation3], %s524_s11, %s524_s11, %s525_s12  }
  0x1a   :  { %s526_s1 = smov [#allocation7]  }
  0x1b   :  { %s50_s15 = sshll.u32 %s526_s1, 4  ;;  %s51_s15 = int_to_ptr.vmem [resolvable:$true] %s50_s15 }
  0x1c   :  { %s482_s16 = scalar_lea.vmem %s51_s15, 2048  ;;  %p487_p11 = scmp.lt.s32.totalorder %s51_s15, %s51_s15 }
  0x1d   :  { %p483_p10 = scmp.ne.s32.totalorder %s51_s15, %s482_s16  ;;  %p488_p12 = scmp.lt.s32.totalorder %s482_s16, %s482_s16 }
  0x1f   :  { %p489_p13 = por %p488_p12, %p487_p11 }
  0x21   :  { %p490_p0 = pnand %p489_p13, %p483_p10 }
  0x23   :  { %493 = shalt.err (!%p490_p0)
}
  0x24   :  { %56 = dma.hbm_to_vmem [thread:$0]  %s607_s5, 2048, %s51_s15, [#allocation6], %s524_s11, %s524_s11, %s525_s12  }
  0x25   :  { %514 = dma.done.wait [#allocation3], 256  }
  0x26   :  { %515 = vsyncadd [#allocation3], 4294967040 }
  0x27   :  { %516 = dma.done.wait [#allocation6], 3072  }
  0x28   :  { %517 = vsyncadd [#allocation6], 4294964224  ;;  %v527_v0 = vmov 0.0   ;;  %v77_v1 = vld [vmem:[#allocation5 + $0x38] sm:$0xff]  ;;  %v76_v2 = vld [vmem:[#allocation5 + $0x30] sm:$0xff]  ;;  %vm90_vm0 = vcmask 261120   ;;  %v80_v11 = vlaneseq }
  0x29   :  { %161 = vmatprep.mubr.f32.mxu0 %v527_v0  ;;  %v75_v3 = vld [vmem:[#allocation5 + $0x28] sm:$0xff]  ;;  %121 = vmatprep.subr.mxu0 %v77_v1  ;;  %v74_v4 = vld [vmem:[#allocation5 + $0x20] sm:$0xff]  ;;  %v73_v5 = vld [vmem:[#allocation5 + $0x18] sm:$0xff]  ;;  %s528_s24 = smov [#allocation8]  }
  0x2a   :  { %122 = vmatpush1.msra.mxu0 %v76_v2  ;;  %v72_v6 = vld [vmem:[#allocation5 + $0x10] sm:$0xff]  ;;  %v71_v7 = vld [vmem:[#allocation5 + $0x8] sm:$0xff]  ;;  %v70_v8 = vld [vmem:[#allocation5] sm:$0xff]  ;;  %v81_v12 = vshrl.u32 %v80_v11, 7 }
  0x2b   :  { %123 = vmatprep.subr.mxu0 %v75_v3  ;;  %v68_v9 = vld [vmem:[#allocation2] sm:$0xff]  ;;  %v69_v10 = vld [vmem:[#allocation2 + $0x8] sm:$0xff]  ;;  %v250_v54 = vld [vmem:[#allocation7 + $0x68] sm:$0xff] }
  0x2c   :  { %124 = vmatpush1.msra.mxu0 %v74_v4  ;;  %v82_v13 = vsub.s32 0, %v81_v12  ;;  %v78_v14 = vld [vmem:[%s604_s2] sm:$0x3]  ;;  %v86_v31 = vsub.s32 1, %v81_v12  ;;  %v252_v44 = vld [vmem:[#allocation7 + $0x78] sm:$0xff]  ;;  %v249_v55 = vld [vmem:[#allocation7 + $0x60] sm:$0xff] }
  0x2d   :  { %125 = vmatprep.subr.mxu0 %v73_v5  ;;  %v251_v45 = vld [vmem:[#allocation7 + $0x70] sm:$0xff]  ;;  %378 = vmatprep.subr.mxu1 %v252_v44  ;;  %v248_v56 = vld [vmem:[#allocation7 + $0x58] sm:$0xff]  ;;  %v246_v58 = vld [vmem:[#allocation7 + $0x48] sm:$0xff] }
  0x2e   :  { %126 = vmatpush1.msra.mxu0 %v72_v6  ;;  %v83_v15 = vrot.slane %v78_v14, %v82_v13  ;;  %v87_v32 = vrot.slane %v78_v14, %v86_v31  ;;  %379 = vmatpush3.msra.mxu1 %v252_v44  ;;  %v247_v57 = vld [vmem:[#allocation7 + $0x50] sm:$0xff]  ;;  %v245_v59 = vld [vmem:[#allocation7 + $0x40] sm:$0xff]  ;;  %v244_v60 = vld [vmem:[#allocation7 + $0x38] sm:$0xff] }
  0x2f   :  { %127 = vmatprep.subr.mxu0 %v71_v7  ;;  %380 = vmatprep.subr.mxu1 %v251_v45  ;;  %v243_v61 = vld [vmem:[#allocation7 + $0x30] sm:$0xff]  ;;  %v242_v62 = vld [vmem:[#allocation7 + $0x28] sm:$0xff]  ;;  %v241_v63 = vld [vmem:[#allocation7 + $0x20] sm:$0xff] }
  0x30   :  { %128 = vmatpush1.msra.mxu0 %v70_v8  ;;  %381 = vmatpush3.msra.mxu1 %v251_v45  ;;  %v239_v1 = vld [vmem:[#allocation7 + $0x10] sm:$0xff]  ;;  %v238_v2 = vld [vmem:[#allocation7 + $0x8] sm:$0xff]  ;;  %v237_v3 = vld [vmem:[#allocation7] sm:$0xff] }
  0x31   :  { %355 = vmatmul.mubr.msk.f32.vlgmr.msra.gmra.mxu0 %vm90_vm0, %v68_v9  ;;  %382 = vmatprep.subr.mxu1 %v250_v54  ;;  %v357_v11 = vld [vmem:[%s605_s3] ss:$0 sm:$0xff]  ;;  %s342_s3 = sshll.u32 %s528_s24, 4  ;;  %s343_s3 = int_to_ptr.vmem [resolvable:$true] %s342_s3 }
  0x32   :  { %167 = vmatprep.mubr.f32.mxu0 %v527_v0  ;;  %383 = vmatpush3.msra.mxu1 %v250_v54  ;;  %v240_v0 = vld [vmem:[#allocation7 + $0x18] sm:$0xff]  ;;  %v358_v13 = vld [vmem:[%s606_s4] ss:$0 sm:$0xff]  ;;  %s494_s4 = scalar_lea.vmem %s343_s3, 256  ;;  %p499_p2 = scmp.lt.s32.totalorder %s343_s3, %s343_s3 }
  0x33   :  { %384 = vmatprep.subr.mxu1 %v249_v55  ;;  %p495_p1 = scmp.ne.s32.totalorder %s343_s3, %s494_s4  ;;  %p500_p3 = scmp.lt.s32.totalorder %s494_s4, %s494_s4 }
  0x34   :  { %385 = vmatpush3.msra.mxu1 %v249_v55 }
  0x35   :  { %356 = vmatmul.mubr.msk.f32.gmra.mxu0 %vm90_vm0, %v69_v10  ;;  %386 = vmatprep.subr.mxu1 %v248_v56  ;;  %p501_p4 = por %p500_p3, %p499_p2 }
  0x36   :  { %387 = vmatpush3.msra.mxu1 %v248_v56 }
  0x37   :  { %388 = vmatprep.subr.mxu1 %v247_v57  ;;  %p502_p5 = pnand %p501_p4, %p495_p1 }
  0x38   :  { %389 = vmatpush3.msra.mxu1 %v247_v57 }
  0x39   :  { %390 = vmatprep.subr.mxu1 %v246_v58 }
  0x3a   :  { %391 = vmatpush3.msra.mxu1 %v246_v58 }
  0x3b   :  { %392 = vmatprep.subr.mxu1 %v245_v59 }
  0x3c   :  { %393 = vmatpush3.msra.mxu1 %v245_v59 }
  0x3d   :  { %394 = vmatprep.subr.mxu1 %v244_v60 }
  0x3e   :  { %395 = vmatpush3.msra.mxu1 %v244_v60 }
  0x3f   :  { %396 = vmatprep.subr.mxu1 %v243_v61 }
  0x40   :  { %397 = vmatpush3.msra.mxu1 %v243_v61 }
  0x41   :  { %398 = vmatprep.subr.mxu1 %v242_v62 }
  0x42   :  { %399 = vmatpush3.msra.mxu1 %v242_v62 }
  0x43   :  { %400 = vmatprep.subr.mxu1 %v241_v63 }
  0x44   :  { %401 = vmatpush3.msra.mxu1 %v241_v63 }
  0x45   :  { %402 = vmatprep.subr.mxu1 %v240_v0 }
  0x46   :  { %403 = vmatpush3.msra.mxu1 %v240_v0 }
  0x47   :  { %404 = vmatprep.subr.mxu1 %v239_v1 }
  0x48   :  { %405 = vmatpush3.msra.mxu1 %v239_v1 }
  0x49   :  { %406 = vmatprep.subr.mxu1 %v238_v2 }
  0x4a   :  { %407 = vmatpush3.msra.mxu1 %v238_v2 }
  0x4b   :  { %408 = vmatprep.subr.mxu1 %v237_v3 }
  0x4c   :  { %409 = vmatpush3.msra.mxu1 %v237_v3 }
  0xf1   :  { %v163_v16 = vpop.f32.mrf.mxu0 }
  0xf2   :  { %v164_v17 = vadd.f32 %v163_v16, %v83_v15 }
  0xf3   :  { %v165_v18 = vpop.f32.mrf.mxu0 }
  0xf4   :  { %174 = vmax.xlane.f32.xlu0 %v164_v17  ;;  %v166_v35 = vadd.f32 %v165_v18, %v87_v32 }
  0xf5   :  { %v169_v19 = vpop.f32.mrf.mxu0 }
  0xf6   :  { %v170_v20 = vadd.f32 %v169_v19, %v83_v15 }
  0xf7   :  { %v171_v38 = vpop.f32.mrf.mxu0 }
  0xf8   :  { %176 = vmax.xlane.f32.xlu0 %v170_v20  ;;  %v172_v41 = vadd.f32 %v171_v38, %v87_v32 }
 0x17d   :  { %v175_v21 = vpop.xlane.xlu0 %174 }
 0x17e   :  { %v178_v22 = vsub.f32 %v164_v17, %v175_v21 }
 0x180   :  { %v180_v23 = vmul.f32 1.442695, %v178_v22 }
 0x181   :  { %v177_v24 = vpop.xlane.xlu0 %176 }
 0x182   :  { %422 = vpow2.f32 %v180_v23  ;;  %v179_v25 = vsub.f32 %v170_v20, %v177_v24 }
 0x184   :  { %v182_v26 = vmul.f32 1.442695, %v179_v25 }
 0x186   :  { %424 = vpow2.f32 %v182_v26 }
 0x18f   :  { %v423_v27 = vpop.eup %422 }
 0x190   :  { %184 = vadd.xlane.f32.xlu1 %v423_v27 }
 0x193   :  { %v425_v28 = vpop.eup %424 }
 0x194   :  { %186 = vadd.xlane.f32.xlu1 %v425_v28 }
 0x219   :  { %v185_v29 = vpop.xlane.xlu1 %184 }
 0x21a   :  { %426 = vrcp.f32 %v185_v29 }
 0x21d   :  { %v187_v30 = vpop.xlane.xlu1 %186 }
 0x21e   :  { %428 = vrcp.f32 %v187_v30 }
 0x227   :  { %v427_v33 = vpop.eup %426 }
 0x228   :  { %v190_v34 = vmul.f32 %v427_v33, %v423_v27 }
 0x22a   :  { %v192_v36 = vmul.f32 %v190_v34, %v164_v17 }
 0x22b   :  { %v429_v37 = vpop.eup %428 }
 0x22c   :  { %v194_v39 = vmul.f32 %v192_v36, %v166_v35  ;;  %v191_v40 = vmul.f32 %v429_v37, %v425_v28 }
 0x22e   :  { %196 = vadd.xlane.f32.xlu0 %v194_v39  ;;  %v193_v42 = vmul.f32 %v191_v40, %v170_v20  ;;  %v359_v20 = vld [vmem:[%s608_s6] ss:$0 sm:$0xff] }
 0x230   :  { %v195_v43 = vmul.f32 %v193_v42, %v172_v41 }
 0x232   :  { %198 = vadd.xlane.f32.xlu1 %v195_v43 }
 0x2b7   :  { %v197_v46 = vpop.xlane.xlu0 %196 }
 0x2b8   :  { %v201_v47 = vmul.f32 0.0078125, %v197_v46 }
 0x2ba   :  { %v203_v48 = vsub.f32 %v194_v39, %v201_v47 }
 0x2bb   :  { %v199_v49 = vpop.xlane.xlu1 %198 }
 0x2bc   :  { %v202_v50 = vmul.f32 0.0078125, %v199_v49  ;;  %v205_v51 = vmul.f32 %v203_v48, %v203_v48 }
 0x2be   :  { %v204_v52 = vsub.f32 %v195_v43, %v202_v50  ;;  %207 = vadd.xlane.f32.xlu0 %v205_v51 }
 0x2c0   :  { %v206_v53 = vmul.f32 %v204_v52, %v204_v52 }
 0x2c2   :  { %209 = vadd.xlane.f32.xlu1 %v206_v53 }
 0x347   :  { %v208_v4 = vpop.xlane.xlu0 %207 }
 0x348   :  { %v211_v5 = vmul.f32 0.0078125, %v208_v4 }
 0x34a   :  { %v213_v6 = vadd.f32 1e-05, %v211_v5 }
 0x34b   :  { %v210_v7 = vpop.xlane.xlu1 %209 }
 0x34c   :  { %430 = vrsqrt.f32 %v213_v6  ;;  %v212_v8 = vmul.f32 0.0078125, %v210_v7 }
 0x34e   :  { %v214_v9 = vadd.f32 1e-05, %v212_v8 }
 0x350   :  { %432 = vrsqrt.f32 %v214_v9 }
 0x359   :  { %v431_v10 = vpop.eup %430 }
 0x35a   :  { %v217_v12 = vmul.f32 %v431_v10, %v203_v48 }
 0x35c   :  { %v226_v14 = vmul.f32 %v357_v11, %v217_v12 }
 0x35d   :  { %v433_v15 = vpop.eup %432 }
 0x35e   :  { %v218_v16 = vmul.f32 %v433_v15, %v204_v52  ;;  %v235_v17 = vadd.f32 %v358_v13, %v226_v14 }
 0x360   :  { %v227_v18 = vmul.f32 %v357_v11, %v218_v16  ;;  %410 = vmatprep.mubr.f32.mxu1 %v235_v17 }
 0x362   :  { %v236_v19 = vadd.f32 %v358_v13, %v227_v18 }
 0x364   :  { %411 = vmatmul.mubr.f32.vlgmr.msra.gmra.mxu1 %v236_v19 }
 0x424   :  { %v412_v21 = vpop.f32.mrf.mxu1 }
 0x425   :  { %v332_v22 = vadd.f32 %v412_v21, %v359_v20 }
 0x426   :  { %v326_v23 = vpop.f32.mrf.mxu1 }
 0x427   :  { %336 = vst [vmem:[#allocation8 + $0x8] sm:$0xff] %v332_v22  ;;  %v327_v24 = vadd.f32 %v359_v20, %v326_v23 }
 0x429   :  { %335 = vst [vmem:[#allocation8] sm:$0xff] %v327_v24 }
 0x42a   :  { %505 = shalt.err (!%p502_p5)
}
 0x42b   :  { %348 = dma.vmem_to_hbm [thread:$0]  %s343_s3, 256, %s609_s7, [#allocation4], %s524_s11, %s524_s11, %s525_s12  }
 0x42c   :  { %518 = dma.done.wait [#allocation4], 256  }
 0x42d   :  { %519 = vsyncadd [#allocation4], 4294967040 }
 0x42e   :  { %352 = vsyncpa [#allocation3], 1 }
 0x42f   :  { %353 = vsyncpa [#allocation6], 1 }
 0x430   :  { %354 = vsyncpa [#allocation4], 1 }

// kernel: tpu_custom_call.1
= control target key start
LH: loop header
LB: loop body
LE: loop exit
PB: predicated region body
PF: predicated region fallthrough
CT: control target
= control target key end

     0   :  { %12 = vsyncpa [#allocation3], 0  ;;  %s602_s0 = inlined_call_operand.hbm [shape: f32[16,32], index: 0, kind: input, shape index: {}]   ;;  %s603_s1 = inlined_call_operand.hbm [shape: f32[32,256], index: 1, kind: input, shape index: {}]   ;;  %s604_s2 = inlined_call_operand.vmem [shape: f32[1,256], index: 2, kind: input, shape index: {}]   ;;  %s605_s3 = inlined_call_operand.vmem [shape: f32[1,128], index: 3, kind: input, shape index: {}]   ;;  %s606_s4 = inlined_call_operand.vmem [shape: f32[1,128], index: 4, kind: input, shape index: {}]   ;;  %s607_s5 = inlined_call_operand.hbm [shape: f32[128,128], index: 5, kind: input, shape index: {}]   ;;  %s608_s6 = inlined_call_operand.vmem [shape: f32[1,128], index: 6, kind: input, shape index: {}]   ;;  %s609_s7 = inlined_call_operand.hbm [shape: f32[16,128], index: 7, kind: output, shape index: {}]  }
   0x1   :  { %13 = vsyncpa [#allocation6], 0 }
   0x2   :  { %14 = vsyncpa [#allocation4], 0  ;;  %s520_s24 = smov [#allocation5]  }
   0x3   :  { %s32_s25 = sshll.u32 %s520_s24, 4  ;;  %s33_s25 = int_to_ptr.vmem [resolvable:$true] %s32_s25 }
   0x4   :  { %s442_s26 = scalar_lea.vmem %s33_s25, 1024  ;;  %p447_p1 = scmp.lt.s32.totalorder %s33_s25, %s33_s25 }
   0x5   :  { %p443_p0 = scmp.ne.s32.totalorder %s33_s25, %s442_s26  ;;  %p448_p2 = scmp.lt.s32.totalorder %s442_s26, %s442_s26 }
   0x7   :  { %p449_p3 = por %p448_p2, %p447_p1 }
   0x9   :  { %p450_p4 = pnand %p449_p3, %p443_p0 }
   0xb   :  { %453 = shalt.err (!%p450_p4)
}
   0xc   :  { %s521_s27 = smov 256   ;;  %s522_s28 = smov 16  }
   0xd   :  { %38 = dma.hbm_to_vmem [thread:$0]  %s603_s1, 1024, %s33_s25, [#allocation6], %s521_s27, %s521_s27, %s522_s28  }
   0xe   :  { %s523_s8 = smov [#allocation2]  }
   0xf   :  { %s20_s9 = sshll.u32 %s523_s8, 4  ;;  %s21_s9 = int_to_ptr.vmem [resolvable:$true] %s20_s9 }
  0x10   :  { %s462_s10 = scalar_lea.vmem %s21_s9, 256  ;;  %p467_p6 = scmp.lt.s32.totalorder %s21_s9, %s21_s9 }
  0x11   :  { %p463_p5 = scmp.ne.s32.totalorder %s21_s9, %s462_s10  ;;  %p468_p7 = scmp.lt.s32.totalorder %s462_s10, %s462_s10 }
  0x13   :  { %p469_p8 = por %p468_p7, %p467_p6 }
  0x15   :  { %p470_p9 = pnand %p469_p8, %p463_p5 }
  0x17   :  { %473 = shalt.err (!%p470_p9)
}
  0x18   :  { %s524_s11 = smov 128   ;;  %s525_s12 = smov 8  }
  0x19   :  { %26 = dma.hbm_to_vmem [thread:$0]  %s602_s0, 256, %s21_s9, [#allocation3], %s524_s11, %s524_s11, %s525_s12  }
  0x1a   :  { %s526_s1 = smov [#allocation7]  }
  0x1b   :  { %s50_s15 = sshll.u32 %s526_s1, 4  ;;  %s51_s15 = int_to_ptr.vmem [resolvable:$true] %s50_s15 }
  0x1c   :  { %s482_s16 = scalar_lea.vmem %s51_s15, 2048  ;;  %p487_p11 = scmp.lt.s32.totalorder %s51_s15, %s51_s15 }
  0x1d   :  { %p483_p10 = scmp.ne.s32.totalorder %s51_s15, %s482_s16  ;;  %p488_p12 = scmp.lt.s32.totalorder %s482_s16, %s482_s16 }
  0x1f   :  { %p489_p13 = por %p488_p12, %p487_p11 }
  0x21   :  { %p490_p0 = pnand %p489_p13, %p483_p10 }
  0x23   :  { %493 = shalt.err (!%p490_p0)
}
  0x24   :  { %56 = dma.hbm_to_vmem [thread:$0]  %s607_s5, 2048, %s51_s15, [#allocation6], %s524_s11, %s524_s11, %s525_s12  }
  0x25   :  { %514 = dma.done.wait [#allocation3], 256  }
  0x26   :  { %515 = vsyncadd [#allocation3], 4294967040 }
  0x27   :  { %516 = dma.done.wait [#allocation6], 3072  }
  0x28   :  { %517 = vsyncadd [#allocation6], 4294964224  ;;  %v527_v0 = vmov 0.0   ;;  %v77_v1 = vld [vmem:[#allocation5 + $0x38] sm:$0xff]  ;;  %v76_v2 = vld [vmem:[#allocation5 + $0x30] sm:$0xff]  ;;  %vm90_vm0 = vcmask 261120   ;;  %v80_v11 = vlaneseq }
  0x29   :  { %161 = vmatprep.mubr.f32.mxu0 %v527_v0  ;;  %v75_v3 = vld [vmem:[#allocation5 + $0x28] sm:$0xff]  ;;  %121 = vmatprep.subr.mxu0 %v77_v1  ;;  %v74_v4 = vld [vmem:[#allocation5 + $0x20] sm:$0xff]  ;;  %v73_v5 = vld [vmem:[#allocation5 + $0x18] sm:$0xff]  ;;  %s528_s24 = smov [#allocation8]  }
  0x2a   :  { %122 = vmatpush1.msra.mxu0 %v76_v2  ;;  %v72_v6 = vld [vmem:[#allocation5 + $0x10] sm:$0xff]  ;;  %v71_v7 = vld [vmem:[#allocation5 + $0x8] sm:$0xff]  ;;  %v70_v8 = vld [vmem:[#allocation5] sm:$0xff]  ;;  %v81_v12 = vshrl.u32 %v80_v11, 7 }
  0x2b   :  { %123 = vmatprep.subr.mxu0 %v75_v3  ;;  %v68_v9 = vld [vmem:[#allocation2] sm:$0xff]  ;;  %v69_v10 = vld [vmem:[#allocation2 + $0x8] sm:$0xff]  ;;  %v250_v54 = vld [vmem:[#allocation7 + $0x68] sm:$0xff] }
  0x2c   :  { %124 = vmatpush1.msra.mxu0 %v74_v4  ;;  %v82_v13 = vsub.s32 0, %v81_v12  ;;  %v78_v14 = vld [vmem:[%s604_s2] sm:$0x3]  ;;  %v86_v31 = vsub.s32 1, %v81_v12  ;;  %v252_v44 = vld [vmem:[#allocation7 + $0x78] sm:$0xff]  ;;  %v249_v55 = vld [vmem:[#allocation7 + $0x60] sm:$0xff] }
  0x2d   :  { %125 = vmatprep.subr.mxu0 %v73_v5  ;;  %v251_v45 = vld [vmem:[#allocation7 + $0x70] sm:$0xff]  ;;  %378 = vmatprep.subr.mxu1 %v252_v44  ;;  %v248_v56 = vld [vmem:[#allocation7 + $0x58] sm:$0xff]  ;;  %v246_v58 = vld [vmem:[#allocation7 + $0x48] sm:$0xff] }
  0x2e   :  { %126 = vmatpush1.msra.mxu0 %v72_v6  ;;  %v83_v15 = vrot.slane %v78_v14, %v82_v13  ;;  %v87_v32 = vrot.slane %v78_v14, %v86_v31  ;;  %379 = vmatpush3.msra.mxu1 %v252_v44  ;;  %v247_v57 = vld [vmem:[#allocation7 + $0x50] sm:$0xff]  ;;  %v245_v59 = vld [vmem:[#allocation7 + $0x40] sm:$0xff]  ;;  %v244_v60 = vld [vmem:[#allocation7 + $0x38] sm:$0xff] }
  0x2f   :  { %127 = vmatprep.subr.mxu0 %v71_v7  ;;  %380 = vmatprep.subr.mxu1 %v251_v45  ;;  %v243_v61 = vld [vmem:[#allocation7 + $0x30] sm:$0xff]  ;;  %v242_v62 = vld [vmem:[#allocation7 + $0x28] sm:$0xff]  ;;  %v241_v63 = vld [vmem:[#allocation7 + $0x20] sm:$0xff] }
  0x30   :  { %128 = vmatpush1.msra.mxu0 %v70_v8  ;;  %381 = vmatpush3.msra.mxu1 %v251_v45  ;;  %v239_v1 = vld [vmem:[#allocation7 + $0x10] sm:$0xff]  ;;  %v238_v2 = vld [vmem:[#allocation7 + $0x8] sm:$0xff]  ;;  %v237_v3 = vld [vmem:[#allocation7] sm:$0xff] }
  0x31   :  { %355 = vmatmul.mubr.msk.f32.vlgmr.msra.gmra.mxu0 %vm90_vm0, %v68_v9  ;;  %382 = vmatprep.subr.mxu1 %v250_v54  ;;  %v357_v11 = vld [vmem:[%s605_s3] ss:$0 sm:$0xff]  ;;  %s342_s3 = sshll.u32 %s528_s24, 4  ;;  %s343_s3 = int_to_ptr.vmem [resolvable:$true] %s342_s3 }
  0x32   :  { %167 = vmatprep.mubr.f32.mxu0 %v527_v0  ;;  %383 = vmatpush3.msra.mxu1 %v250_v54  ;;  %v240_v0 = vld [vmem:[#allocation7 + $0x18] sm:$0xff]  ;;  %v358_v13 = vld [vmem:[%s606_s4] ss:$0 sm:$0xff]  ;;  %s494_s4 = scalar_lea.vmem %s343_s3, 256  ;;  %p499_p2 = scmp.lt.s32.totalorder %s343_s3, %s343_s3 }
  0x33   :  { %384 = vmatprep.subr.mxu1 %v249_v55  ;;  %p495_p1 = scmp.ne.s32.totalorder %s343_s3, %s494_s4  ;;  %p500_p3 = scmp.lt.s32.totalorder %s494_s4, %s494_s4 }
  0x34   :  { %385 = vmatpush3.msra.mxu1 %v249_v55 }
  0x35   :  { %356 = vmatmul.mubr.msk.f32.gmra.mxu0 %vm90_vm0, %v69_v10  ;;  %386 = vmatprep.subr.mxu1 %v248_v56  ;;  %p501_p4 = por %p500_p3, %p499_p2 }
  0x36   :  { %387 = vmatpush3.msra.mxu1 %v248_v56 }
  0x37   :  { %388 = vmatprep.subr.mxu1 %v247_v57  ;;  %p502_p5 = pnand %p501_p4, %p495_p1 }
  0x38   :  { %389 = vmatpush3.msra.mxu1 %v247_v57 }
  0x39   :  { %390 = vmatprep.subr.mxu1 %v246_v58 }
  0x3a   :  { %391 = vmatpush3.msra.mxu1 %v246_v58 }
  0x3b   :  { %392 = vmatprep.subr.mxu1 %v245_v59 }
  0x3c   :  { %393 = vmatpush3.msra.mxu1 %v245_v59 }
  0x3d   :  { %394 = vmatprep.subr.mxu1 %v244_v60 }
  0x3e   :  { %395 = vmatpush3.msra.mxu1 %v244_v60 }
  0x3f   :  { %396 = vmatprep.subr.mxu1 %v243_v61 }
  0x40   :  { %397 = vmatpush3.msra.mxu1 %v243_v61 }
  0x41   :  { %398 = vmatprep.subr.mxu1 %v242_v62 }
  0x42   :  { %399 = vmatpush3.msra.mxu1 %v242_v62 }
  0x43   :  { %400 = vmatprep.subr.mxu1 %v241_v63 }
  0x44   :  { %401 = vmatpush3.msra.mxu1 %v241_v63 }
  0x45   :  { %402 = vmatprep.subr.mxu1 %v240_v0 }
  0x46   :  { %403 = vmatpush3.msra.mxu1 %v240_v0 }
  0x47   :  { %404 = vmatprep.subr.mxu1 %v239_v1 }
  0x48   :  { %405 = vmatpush3.msra.mxu1 %v239_v1 }
  0x49   :  { %406 = vmatprep.subr.mxu1 %v238_v2 }
  0x4a   :  { %407 = vmatpush3.msra.mxu1 %v238_v2 }
  0x4b   :  { %408 = vmatprep.subr.mxu1 %v237_v3 }
  0x4c   :  { %409 = vmatpush3.msra.mxu1 %v237_v3 }
  0xf1   :  { %v163_v16 = vpop.f32.mrf.mxu0 }
  0xf2   :  { %v164_v17 = vadd.f32 %v163_v16, %v83_v15 }
  0xf3   :  { %v165_v18 = vpop.f32.mrf.mxu0 }
  0xf4   :  { %174 = vmax.xlane.f32.xlu0 %v164_v17  ;;  %v166_v35 = vadd.f32 %v165_v18, %v87_v32 }
  0xf5   :  { %v169_v19 = vpop.f32.mrf.mxu0 }
  0xf6   :  { %v170_v20 = vadd.f32 %v169_v19, %v83_v15 }
  0xf7   :  { %v171_v38 = vpop.f32.mrf.mxu0 }
  0xf8   :  { %176 = vmax.xlane.f32.xlu0 %v170_v20  ;;  %v172_v41 = vadd.f32 %v171_v38, %v87_v32 }
 0x17d   :  { %v175_v21 = vpop.xlane.xlu0 %174 }
 0x17e   :  { %v178_v22 = vsub.f32 %v164_v17, %v175_v21 }
 0x180   :  { %v180_v23 = vmul.f32 1.442695, %v178_v22 }
 0x181   :  { %v177_v24 = vpop.xlane.xlu0 %176 }
 0x182   :  { %422 = vpow2.f32 %v180_v23  ;;  %v179_v25 = vsub.f32 %v170_v20, %v177_v24 }
 0x184   :  { %v182_v26 = vmul.f32 1.442695, %v179_v25 }
 0x186   :  { %424 = vpow2.f32 %v182_v26 }
 0x18f   :  { %v423_v27 = vpop.eup %422 }
 0x190   :  { %184 = vadd.xlane.f32.xlu1 %v423_v27 }
 0x193   :  { %v425_v28 = vpop.eup %424 }
 0x194   :  { %186 = vadd.xlane.f32.xlu1 %v425_v28 }
 0x219   :  { %v185_v29 = vpop.xlane.xlu1 %184 }
 0x21a   :  { %426 = vrcp.f32 %v185_v29 }
 0x21d   :  { %v187_v30 = vpop.xlane.xlu1 %186 }
 0x21e   :  { %428 = vrcp.f32 %v187_v30 }
 0x227   :  { %v427_v33 = vpop.eup %426 }
 0x228   :  { %v190_v34 = vmul.f32 %v427_v33, %v423_v27 }
 0x22a   :  { %v192_v36 = vmul.f32 %v190_v34, %v164_v17 }
 0x22b   :  { %v429_v37 = vpop.eup %428 }
 0x22c   :  { %v194_v39 = vmul.f32 %v192_v36, %v166_v35  ;;  %v191_v40 = vmul.f32 %v429_v37, %v425_v28 }
 0x22e   :  { %196 = vadd.xlane.f32.xlu0 %v194_v39  ;;  %v193_v42 = vmul.f32 %v191_v40, %v170_v20  ;;  %v359_v20 = vld [vmem:[%s608_s6] ss:$0 sm:$0xff] }
 0x230   :  { %v195_v43 = vmul.f32 %v193_v42, %v172_v41 }
 0x232   :  { %198 = vadd.xlane.f32.xlu1 %v195_v43 }
 0x2b7   :  { %v197_v46 = vpop.xlane.xlu0 %196 }
 0x2b8   :  { %v201_v47 = vmul.f32 0.0078125, %v197_v46 }
 0x2ba   :  { %v203_v48 = vsub.f32 %v194_v39, %v201_v47 }
 0x2bb   :  { %v199_v49 = vpop.xlane.xlu1 %198 }
 0x2bc   :  { %v202_v50 = vmul.f32 0.0078125, %v199_v49  ;;  %v205_v51 = vmul.f32 %v203_v48, %v203_v48 }
 0x2be   :  { %v204_v52 = vsub.f32 %v195_v43, %v202_v50  ;;  %207 = vadd.xlane.f32.xlu0 %v205_v51 }
 0x2c0   :  { %v206_v53 = vmul.f32 %v204_v52, %v204_v52 }
 0x2c2   :  { %209 = vadd.xlane.f32.xlu1 %v206_v53 }
 0x347   :  { %v208_v4 = vpop.xlane.xlu0 %207 }
 0x348   :  { %v211_v5 = vmul.f32 0.0078125, %v208_v4 }
 0x34a   :  { %v213_v6 = vadd.f32 1e-05, %v211_v5 }
 0x34b   :  { %v210_v7 = vpop.xlane.xlu1 %209 }
 0x34c   :  { %430 = vrsqrt.f32 %v213_v6  ;;  %v212_v8 = vmul.f32 0.0078125, %v210_v7 }
 0x34e   :  { %v214_v9 = vadd.f32 1e-05, %v212_v8 }
 0x350   :  { %432 = vrsqrt.f32 %v214_v9 }
 0x359   :  { %v431_v10 = vpop.eup %430 }
 0x35a   :  { %v217_v12 = vmul.f32 %v431_v10, %v203_v48 }
 0x35c   :  { %v226_v14 = vmul.f32 %v357_v11, %v217_v12 }
 0x35d   :  { %v433_v15 = vpop.eup %432 }
 0x35e   :  { %v218_v16 = vmul.f32 %v433_v15, %v204_v52  ;;  %v235_v17 = vadd.f32 %v358_v13, %v226_v14 }
 0x360   :  { %v227_v18 = vmul.f32 %v357_v11, %v218_v16  ;;  %410 = vmatprep.mubr.f32.mxu1 %v235_v17 }
 0x362   :  { %v236_v19 = vadd.f32 %v358_v13, %v227_v18 }
 0x364   :  { %411 = vmatmul.mubr.f32.vlgmr.msra.gmra.mxu1 %v236_v19 }
 0x424   :  { %v412_v21 = vpop.f32.mrf.mxu1 }
 0x425   :  { %v332_v22 = vadd.f32 %v412_v21, %v359_v20 }
 0x426   :  { %v326_v23 = vpop.f32.mrf.mxu1 }
 0x427   :  { %336 = vst [vmem:[#allocation8 + $0x8] sm:$0xff] %v332_v22  ;;  %v327_v24 = vadd.f32 %v359_v20, %v326_v23 }
 0x429   :  { %335 = vst [vmem:[#allocation8] sm:$0xff] %v327_v24 }
 0x42a   :  { %505 = shalt.err (!%p502_p5)
}
 0x42b   :  { %348 = dma.vmem_to_hbm [thread:$0]  %s343_s3, 256, %s609_s7, [#allocation4], %s524_s11, %s524_s11, %s525_s12  }
 0x42c   :  { %518 = dma.done.wait [#allocation4], 256  }
 0x42d   :  { %519 = vsyncadd [#allocation4], 4294967040 }
 0x42e   :  { %352 = vsyncpa [#allocation3], 1 }
 0x42f   :  { %353 = vsyncpa [#allocation6], 1 }
 0x430   :  { %354 = vsyncpa [#allocation4], 1 }

</bundles_post_ra>
